<compile_context>
chip_gen: v7x
topology: tpu7x:2x2x1
jax: 0.10.0
libtpu: 0.0.40
codegen_flags: <defaults>
</compile_context>

<pallas_src>
import jax
import jax.numpy as jnp
from jax.experimental import pallas as pl
from jax.experimental.pallas import tpu as pltpu

_LANE = 128
_SUBLANE = 8
_N_LAYERS = 6  # lin1..lin5 + out
_TILE_M_CAP = 1024


def _round_up(x, m):
    return (x + m - 1) // m * m


def _classifier_kernel(x_ref, w_ref, b_ref, o_ref):
    """Fused 6-layer MLP + 2-class log_softmax.

    x_ref : (TILE_M, DP)   bf16  activations (zero-padded feature axis)
    w_ref : (6, DP, DP)    bf16  packed weights; layer 5 holds the class-diff
                                  column (wo[:,1]-wo[:,0]) in every lane
    b_ref : (6, 1, DP)     f32   packed biases; layer 5 holds bo[1]-bo[0]
    o_ref : (TILE_M, DP)   bf16  lane 0 = log p(class 0), lane 1 = log p(class 1),
                                  lanes >= 2 are don't-care
    """
    y = x_ref[...]  # bf16

    # Five hidden Linear + ReLU layers: bf16 MXU inputs, f32 accumulation,
    # (1, DP) bias broadcast-add + ReLU in f32 on the VPU.
    for i in range(5):
        z = jnp.dot(y, w_ref[i], preferred_element_type=jnp.float32) + b_ref[i]
        y = jnp.maximum(z, 0.0).astype(jnp.bfloat16)

    # Output layer of the packed stack yields d = logit1 - logit0 broadcast
    # across all 128 lanes (lane-dense; no cross-lane reduction needed).
    d = jnp.dot(y, w_ref[5], preferred_element_type=jnp.float32) + b_ref[5]

    # 2-class log_softmax, numerically stable, ONE softplus:
    #   lp0 = -softplus(d);  lp1 = -softplus(-d) = lp0 + d
    sp = jnp.maximum(d, 0.0) + jnp.log1p(jnp.exp(-jnp.abs(d)))
    lp0 = -sp
    col = jax.lax.broadcasted_iota(jnp.int32, d.shape, 1)
    o_ref[...] = (lp0 + jnp.where(col == 1, d, 0.0)).astype(o_ref.dtype)


def _pack_params(params, input_dim, lin_dim, dp):
    """Pack the 6 Linear layers into (6, DP, DP) bf16 + (6, 1, DP) f32."""
    ws, bs = [], []
    in_dims = [input_dim, lin_dim, lin_dim, lin_dim, lin_dim]
    for name, di in zip(["1", "2", "3", "4", "5"], in_dims):
        w = params[f"w{name}"]                       # (di, lin_dim)
        b = params[f"b{name}"]                       # (1, lin_dim)
        ws.append(jnp.zeros((dp, dp), jnp.float32).at[:di, :lin_dim].set(w))
        bs.append(jnp.zeros((1, dp), jnp.float32).at[:, :lin_dim].set(b))
    # Output layer (2 classes) folded into one "difference" column replicated
    # on every lane:  d = y @ (wo[:,1]-wo[:,0]) + (bo[1]-bo[0]).
    wo, bo = params["wo"], params["bo"]              # (lin_dim, 2), (1, 2)
    w_diff = (wo[:, 1] - wo[:, 0])[:, None]          # (lin_dim, 1)
    b_diff = bo[0, 1] - bo[0, 0]
    ws.append(jnp.zeros((dp, dp), jnp.float32).at[:lin_dim, :].set(w_diff))
    bs.append(jnp.full((1, dp), b_diff, jnp.float32))
    w_packed = jnp.stack(ws).astype(jnp.bfloat16)    # (6, DP, DP) bf16
    b_packed = jnp.stack(bs)                         # (6, 1, DP)  f32
    return w_packed, b_packed


def classifier_forward(x, params):
    """x: [batch, input_dim] float32; params: dict of f32 weights/biases."""
    batch, input_dim = x.shape
    lin_dim = params["w1"].shape[1]
    dp = _round_up(max(input_dim, lin_dim), _LANE)

    # Batch tiling: ceil(batch/2) so large batches always produce >= 2 grid
    # steps (v7x megacore can shard the "parallel" axis across both TCs),
    # capped at 1024 rows/tile (VMEM footprint stays ~1.5 MiB double-buffered).
    tile_m = min(_round_up(pl.cdiv(batch, 2), _SUBLANE), _TILE_M_CAP)
    b_pad = _round_up(batch, tile_m)

    # bf16 cast + zero-pad of the activations; allow_input_fusion below lets
    # XLA fuse this into the pallas input DMA instead of a separate HBM pass.
    x_p = jnp.zeros((b_pad, dp), jnp.bfloat16).at[:batch, :input_dim].set(
        x.astype(jnp.bfloat16))
    w_packed, b_packed = _pack_params(params, input_dim, lin_dim, dp)

    grid = (b_pad // tile_m,)
    cost = pl.CostEstimate(
        flops=2 * b_pad * dp * dp * _N_LAYERS,
        transcendentals=2 * b_pad * dp,               # one exp + one log1p
        bytes_accessed=(x_p.size * 2 + w_packed.size * 2 + b_packed.size * 4
                        + b_pad * dp * 2),            # bf16 output slab
    )

    out = pl.pallas_call(
        _classifier_kernel,
        out_shape=jax.ShapeDtypeStruct((b_pad, dp), jnp.bfloat16),
        grid=grid,
        in_specs=[
            pl.BlockSpec((tile_m, dp), lambda i: (i, 0)),             # x tile
            pl.BlockSpec((_N_LAYERS, dp, dp), lambda i: (0, 0, 0)),   # weights (resident)
            pl.BlockSpec((_N_LAYERS, 1, dp), lambda i: (0, 0, 0)),    # biases  (resident)
        ],
        out_specs=pl.BlockSpec((tile_m, dp), lambda i: (i, 0)),       # lane-dense slab
        compiler_params=pltpu.CompilerParams(
            dimension_semantics=("parallel",),
            allow_input_fusion=[True, False, False],  # fuse x pad/cast into DMA
        ),
        cost_estimate=cost,
    )(x_p, w_packed, b_packed)

    logp = out[:batch, :2].astype(jnp.float32)
    # Match PyTorch's `y.squeeze()` (drops any size-1 dims, incl. batch==1).
    return jnp.squeeze(logp)


def init_params(key, input_dim, lin_dim, n_classes=2):
    """Deterministic init matching nn.Linear's U(-1/sqrt(fan_in), 1/sqrt(fan_in))."""
    dims = [(input_dim, lin_dim), (lin_dim, lin_dim), (lin_dim, lin_dim),
            (lin_dim, lin_dim), (lin_dim, lin_dim), (lin_dim, n_classes)]
    names = ["1", "2", "3", "4", "5", "o"]
    params = {}
    for name, (fan_in, fan_out) in zip(names, dims):
        key, kw, kb = jax.random.split(key, 3)
        bound = 1.0 / jnp.sqrt(jnp.float32(fan_in))
        params[f"w{name}"] = jax.random.uniform(
            kw, (fan_in, fan_out), jnp.float32, -bound, bound)
        params[f"b{name}"] = jax.random.uniform(
            kb, (1, fan_out), jnp.float32, -bound, bound)
    return params


def ref_forward(x, params):
    """Pure-JAX f32 reference of the PyTorch module."""
    y = x
    for n in ["1", "2", "3", "4", "5"]:
        y = jax.nn.relu(y @ params[f"w{n}"] + params[f"b{n}"])
    logits = y @ params["wo"] + params["bo"]
    return jnp.squeeze(jax.nn.log_softmax(logits, axis=-1))


if __name__ == "__main__":
    input_dim = 32
    lin_dim = 32
    batch = 8

    key = jax.random.PRNGKey(0)
    key, kx = jax.random.split(key)
    x = jax.random.normal(kx, (batch, input_dim), jnp.float32)
    params = init_params(key, input_dim, lin_dim)

    fwd = jax.jit(classifier_forward)
    y = fwd(x, params)
    jax.block_until_ready(y)

    ref = ref_forward(x, params)

    # Shape matches torch .squeeze() of an (8, 2) result.
    assert y.shape == (batch, 2), y.shape
    # Log-probs over 2 classes exp-sum to ~1 per row (bf16 output quantization
    # allows ~1% slack).
    probs_sum = jnp.sum(jnp.exp(y), axis=-1)
    assert bool(jnp.all(jnp.abs(probs_sum - 1.0) < 3e-2)), probs_sum
    # Matches the f32 reference up to bf16 weight/activation/output quantization.
    assert bool(jnp.max(jnp.abs(y - ref)) < 0.1), float(jnp.max(jnp.abs(y - ref)))

    print("KERNEL_OK")
</pallas_src>

<mosaic_0001>
module attributes {stable_mosaic.version = 11 : i64} {
  func.func @_classifier_kernel(%arg0: i32, %arg1: memref<8x128xbf16, #tpu.memory_space<vmem>>, %arg2: memref<6x128x128xbf16, #tpu.memory_space<vmem>>, %arg3: memref<6x1x128xf32, #tpu.memory_space<vmem>>, %arg4: memref<8x128xbf16, #tpu.memory_space<vmem>>) attributes {dimension_semantics = [#tpu.dimension_semantics<parallel>], iteration_bounds = array<i64: 1>, scalar_prefetch = 0 : i64, scratch_operands = 0 : i64, tpu.core_type = #tpu.core_type<tc>, window_params = [{transform_indices = @transform_0, window_bounds = array<i64: 8, 128>}, {pipeline_mode = #tpu.pipeline_mode<synchronous>, transform_indices = @transform_1, window_bounds = array<i64: 6, 128, 128>}, {pipeline_mode = #tpu.pipeline_mode<synchronous>, transform_indices = @transform_2, window_bounds = array<i64: 6, 1, 128>}, {transform_indices = @transform_3, window_bounds = array<i64: 8, 128>}]} {
    %c0 = arith.constant 0 : index
    %c0_0 = arith.constant 0 : index
    %0 = vector.load %arg1[%c0, %c0_0] : memref<8x128xbf16, #tpu.memory_space<vmem>>, vector<8x128xbf16>
    %c0_1 = arith.constant 0 : index
    %c0_2 = arith.constant 0 : index
    %c0_3 = arith.constant 0 : index
    %1 = vector.load %arg2[%c0_1, %c0_2, %c0_3] : memref<6x128x128xbf16, #tpu.memory_space<vmem>>, vector<1x128x128xbf16>
    %2 = vector.shape_cast %1 : vector<1x128x128xbf16> to vector<128x128xbf16>
    %cst = arith.constant dense<0.000000e+00> : vector<8x128xf32>
    %3 = tpu.matmul %0, %2, %cst {dimension_numbers = #tpu.dot_dimension_numbers<[1], [0], [0], [1], [0, 0, 1, 1], [], []>} : vector<8x128xbf16>, vector<128x128xbf16>, vector<8x128xf32> -> vector<8x128xf32>
    %c0_4 = arith.constant 0 : index
    %c0_5 = arith.constant 0 : index
    %c0_6 = arith.constant 0 : index
    %4 = vector.load %arg3[%c0_4, %c0_5, %c0_6] : memref<6x1x128xf32, #tpu.memory_space<vmem>>, vector<1x1x128xf32>
    %5 = vector.shape_cast %4 : vector<1x1x128xf32> to vector<1x128xf32>
    %6 = vector.broadcast %5 : vector<1x128xf32> to vector<8x128xf32>
    %7 = arith.addf %3, %6 : vector<8x128xf32>
    %cst_7 = arith.constant 0.000000e+00 : f32
    %8 = vector.broadcast %cst_7 : f32 to vector<8x128xf32>
    %9 = arith.maximumf %7, %8 : vector<8x128xf32>
    %10 = arith.truncf %9 : vector<8x128xf32> to vector<8x128xbf16>
    %c1 = arith.constant 1 : index
    %c0_8 = arith.constant 0 : index
    %c0_9 = arith.constant 0 : index
    %11 = vector.load %arg2[%c1, %c0_8, %c0_9] : memref<6x128x128xbf16, #tpu.memory_space<vmem>>, vector<1x128x128xbf16>
    %12 = vector.shape_cast %11 : vector<1x128x128xbf16> to vector<128x128xbf16>
    %cst_10 = arith.constant dense<0.000000e+00> : vector<8x128xf32>
    %13 = tpu.matmul %10, %12, %cst_10 {dimension_numbers = #tpu.dot_dimension_numbers<[1], [0], [0], [1], [0, 0, 1, 1], [], []>} : vector<8x128xbf16>, vector<128x128xbf16>, vector<8x128xf32> -> vector<8x128xf32>
    %c1_11 = arith.constant 1 : index
    %c0_12 = arith.constant 0 : index
    %c0_13 = arith.constant 0 : index
    %14 = vector.load %arg3[%c1_11, %c0_12, %c0_13] : memref<6x1x128xf32, #tpu.memory_space<vmem>>, vector<1x1x128xf32>
    %15 = vector.shape_cast %14 : vector<1x1x128xf32> to vector<1x128xf32>
    %16 = vector.broadcast %15 : vector<1x128xf32> to vector<8x128xf32>
    %17 = arith.addf %13, %16 : vector<8x128xf32>
    %cst_14 = arith.constant 0.000000e+00 : f32
    %18 = vector.broadcast %cst_14 : f32 to vector<8x128xf32>
    %19 = arith.maximumf %17, %18 : vector<8x128xf32>
    %20 = arith.truncf %19 : vector<8x128xf32> to vector<8x128xbf16>
    %c2 = arith.constant 2 : index
    %c0_15 = arith.constant 0 : index
    %c0_16 = arith.constant 0 : index
    %21 = vector.load %arg2[%c2, %c0_15, %c0_16] : memref<6x128x128xbf16, #tpu.memory_space<vmem>>, vector<1x128x128xbf16>
    %22 = vector.shape_cast %21 : vector<1x128x128xbf16> to vector<128x128xbf16>
    %cst_17 = arith.constant dense<0.000000e+00> : vector<8x128xf32>
    %23 = tpu.matmul %20, %22, %cst_17 {dimension_numbers = #tpu.dot_dimension_numbers<[1], [0], [0], [1], [0, 0, 1, 1], [], []>} : vector<8x128xbf16>, vector<128x128xbf16>, vector<8x128xf32> -> vector<8x128xf32>
    %c2_18 = arith.constant 2 : index
    %c0_19 = arith.constant 0 : index
    %c0_20 = arith.constant 0 : index
    %24 = vector.load %arg3[%c2_18, %c0_19, %c0_20] : memref<6x1x128xf32, #tpu.memory_space<vmem>>, vector<1x1x128xf32>
    %25 = vector.shape_cast %24 : vector<1x1x128xf32> to vector<1x128xf32>
    %26 = vector.broadcast %25 : vector<1x128xf32> to vector<8x128xf32>
    %27 = arith.addf %23, %26 : vector<8x128xf32>
    %cst_21 = arith.constant 0.000000e+00 : f32
    %28 = vector.broadcast %cst_21 : f32 to vector<8x128xf32>
    %29 = arith.maximumf %27, %28 : vector<8x128xf32>
    %30 = arith.truncf %29 : vector<8x128xf32> to vector<8x128xbf16>
    %c3 = arith.constant 3 : index
    %c0_22 = arith.constant 0 : index
    %c0_23 = arith.constant 0 : index
    %31 = vector.load %arg2[%c3, %c0_22, %c0_23] : memref<6x128x128xbf16, #tpu.memory_space<vmem>>, vector<1x128x128xbf16>
    %32 = vector.shape_cast %31 : vector<1x128x128xbf16> to vector<128x128xbf16>
    %cst_24 = arith.constant dense<0.000000e+00> : vector<8x128xf32>
    %33 = tpu.matmul %30, %32, %cst_24 {dimension_numbers = #tpu.dot_dimension_numbers<[1], [0], [0], [1], [0, 0, 1, 1], [], []>} : vector<8x128xbf16>, vector<128x128xbf16>, vector<8x128xf32> -> vector<8x128xf32>
    %c3_25 = arith.constant 3 : index
    %c0_26 = arith.constant 0 : index
    %c0_27 = arith.constant 0 : index
    %34 = vector.load %arg3[%c3_25, %c0_26, %c0_27] : memref<6x1x128xf32, #tpu.memory_space<vmem>>, vector<1x1x128xf32>
    %35 = vector.shape_cast %34 : vector<1x1x128xf32> to vector<1x128xf32>
    %36 = vector.broadcast %35 : vector<1x128xf32> to vector<8x128xf32>
    %37 = arith.addf %33, %36 : vector<8x128xf32>
    %cst_28 = arith.constant 0.000000e+00 : f32
    %38 = vector.broadcast %cst_28 : f32 to vector<8x128xf32>
    %39 = arith.maximumf %37, %38 : vector<8x128xf32>
    %40 = arith.truncf %39 : vector<8x128xf32> to vector<8x128xbf16>
    %c4 = arith.constant 4 : index
    %c0_29 = arith.constant 0 : index
    %c0_30 = arith.constant 0 : index
    %41 = vector.load %arg2[%c4, %c0_29, %c0_30] : memref<6x128x128xbf16, #tpu.memory_space<vmem>>, vector<1x128x128xbf16>
    %42 = vector.shape_cast %41 : vector<1x128x128xbf16> to vector<128x128xbf16>
    %cst_31 = arith.constant dense<0.000000e+00> : vector<8x128xf32>
    %43 = tpu.matmul %40, %42, %cst_31 {dimension_numbers = #tpu.dot_dimension_numbers<[1], [0], [0], [1], [0, 0, 1, 1], [], []>} : vector<8x128xbf16>, vector<128x128xbf16>, vector<8x128xf32> -> vector<8x128xf32>
    %c4_32 = arith.constant 4 : index
    %c0_33 = arith.constant 0 : index
    %c0_34 = arith.constant 0 : index
    %44 = vector.load %arg3[%c4_32, %c0_33, %c0_34] : memref<6x1x128xf32, #tpu.memory_space<vmem>>, vector<1x1x128xf32>
    %45 = vector.shape_cast %44 : vector<1x1x128xf32> to vector<1x128xf32>
    %46 = vector.broadcast %45 : vector<1x128xf32> to vector<8x128xf32>
    %47 = arith.addf %43, %46 : vector<8x128xf32>
    %cst_35 = arith.constant 0.000000e+00 : f32
    %48 = vector.broadcast %cst_35 : f32 to vector<8x128xf32>
    %49 = arith.maximumf %47, %48 : vector<8x128xf32>
    %50 = arith.truncf %49 : vector<8x128xf32> to vector<8x128xbf16>
    %c5 = arith.constant 5 : index
    %c0_36 = arith.constant 0 : index
    %c0_37 = arith.constant 0 : index
    %51 = vector.load %arg2[%c5, %c0_36, %c0_37] : memref<6x128x128xbf16, #tpu.memory_space<vmem>>, vector<1x128x128xbf16>
    %52 = vector.shape_cast %51 : vector<1x128x128xbf16> to vector<128x128xbf16>
    %cst_38 = arith.constant dense<0.000000e+00> : vector<8x128xf32>
    %53 = tpu.matmul %50, %52, %cst_38 {dimension_numbers = #tpu.dot_dimension_numbers<[1], [0], [0], [1], [0, 0, 1, 1], [], []>} : vector<8x128xbf16>, vector<128x128xbf16>, vector<8x128xf32> -> vector<8x128xf32>
    %c5_39 = arith.constant 5 : index
    %c0_40 = arith.constant 0 : index
    %c0_41 = arith.constant 0 : index
    %54 = vector.load %arg3[%c5_39, %c0_40, %c0_41] : memref<6x1x128xf32, #tpu.memory_space<vmem>>, vector<1x1x128xf32>
    %55 = vector.shape_cast %54 : vector<1x1x128xf32> to vector<1x128xf32>
    %56 = vector.broadcast %55 : vector<1x128xf32> to vector<8x128xf32>
    %57 = arith.addf %53, %56 : vector<8x128xf32>
    %cst_42 = arith.constant 0.000000e+00 : f32
    %58 = vector.broadcast %cst_42 : f32 to vector<8x128xf32>
    %59 = arith.maximumf %57, %58 : vector<8x128xf32>
    %60 = math.absf %57 : vector<8x128xf32>
    %cst_43 = arith.constant 0.000000e+00 : f32
    %61 = vector.broadcast %cst_43 : f32 to vector<8x128xf32>
    %62 = arith.subf %61, %60 : vector<8x128xf32>
    %63 = math.exp %62 : vector<8x128xf32>
    %64 = math.log1p %63 : vector<8x128xf32>
    %65 = arith.addf %59, %64 : vector<8x128xf32>
    %cst_44 = arith.constant 0.000000e+00 : f32
    %66 = vector.broadcast %cst_44 : f32 to vector<8x128xf32>
    %67 = arith.subf %66, %65 : vector<8x128xf32>
    %68 = tpu.iota {dimensions = array<i32: 1>} : vector<8x128xi32>
    %c1_i32 = arith.constant 1 : i32
    %69 = vector.broadcast %c1_i32 : i32 to vector<8x128xi32>
    %70 = arith.cmpi eq, %68, %69 : vector<8x128xi32>
    %cst_45 = arith.constant 0.000000e+00 : f32
    %71 = vector.broadcast %cst_45 : f32 to vector<8x128xf32>
    %72 = arith.select %70, %57, %71 : vector<8x128xi1>, vector<8x128xf32>
    %73 = arith.addf %67, %72 : vector<8x128xf32>
    %74 = arith.truncf %73 : vector<8x128xf32> to vector<8x128xbf16>
    %c0_46 = arith.constant 0 : index
    %c0_47 = arith.constant 0 : index
    %75 = vector.load %arg4[%c0_46, %c0_47] : memref<8x128xbf16, #tpu.memory_space<vmem>>, vector<8x128xbf16>
    tpu.vector_store %arg4[%c0_46, %c0_47], %74 {strides = array<i32>} : memref<8x128xbf16, #tpu.memory_space<vmem>>, vector<8x128xbf16>,
    return
  }
  func.func @transform_0(%arg0: i32) -> (i32, i32) {
    %c0_i32 = arith.constant 0 : i32
    %c0_i32_0 = arith.constant 0 : i32
    return %arg0, %c0_i32 : i32, i32
  }
  func.func @transform_1(%arg0: i32) -> (i32, i32, i32) {
    %c0_i32 = arith.constant 0 : i32
    %c0_i32_0 = arith.constant 0 : i32
    %c0_i32_1 = arith.constant 0 : i32
    %c0_i32_2 = arith.constant 0 : i32
    return %c0_i32, %c0_i32_0, %c0_i32_1 : i32, i32, i32
  }
  func.func @transform_2(%arg0: i32) -> (i32, i32, i32) {
    %c0_i32 = arith.constant 0 : i32
    %c0_i32_0 = arith.constant 0 : i32
    %c0_i32_1 = arith.constant 0 : i32
    %c0_i32_2 = arith.constant 0 : i32
    return %c0_i32, %c0_i32_0, %c0_i32_1 : i32, i32, i32
  }
  func.func @transform_3(%arg0: i32) -> (i32, i32) {
    %c0_i32 = arith.constant 0 : i32
    %c0_i32_0 = arith.constant 0 : i32
    return %arg0, %c0_i32 : i32, i32
  }
}

</mosaic_0001>

<bundles_post_ra>
// kernel: classifier_forward.2
= control target key start
LH: loop header
LB: loop body
LE: loop exit
PB: predicated region body
PF: predicated region fallthrough
CT: control target
= control target key end

     0   :  { %s1385_s0 = inlined_call_operand.vmem [shape: bf16[6,128,128], index: 0, kind: input, shape index: {}]   ;;  %s1386_s1 = inlined_call_operand.vmem [shape: f32[6,1,128], index: 1, kind: input, shape index: {}]   ;;  %s1387_s2 = inlined_call_operand.vmem [shape: bf16[8,32], index: 2, kind: input, shape index: {}]   ;;  %s1388_s3 = inlined_call_operand.<no memory space> [shape: bf16[], index: 3, kind: input, shape index: {}]   ;;  %s1389_s4 = inlined_call_operand.vmem [shape: bf16[8,128], index: 4, kind: output, shape index: {}]  }
   0x1   :  { %v9_v0 = vstv %s1388_s3 }
   0x2   :  { %v10_v1 = vunpack.i.l.bf16 %v9_v0 }
   0x3   :  { %v1070_v2 = vld [vmem:[%s1385_s0] sm:$0xff]   ;;  %v32_v3 = vlaneseq  ;;  %v1122_v4 = vmov 0.0   ;;  %v1071_v5 = vld [vmem:[%s1385_s0 + $0x8] sm:$0xff]   ;;  %vm1123_vm0 = vmmov 0   ;;  %v1072_v7 = vld [vmem:[%s1385_s0 + $0x10] sm:$0xff]  }
   0x4   :  { %948 = vmatprep.subr.bf16.mxu0 %v1122_v4  ;;  %968 = vmatprep.subr.bf16.mxu1 %v1122_v4  ;;  %v29_v8 = vld [vmem:[%s1387_s2] sm:$0xf]  ;;  %v1073_v11 = vld [vmem:[%s1385_s0 + $0x18] sm:$0xff]   ;;  %v1079_v13 = vld [vmem:[%s1385_s0 + $0x48] sm:$0xff]  }
   0x5   :  { %949 = vmatpush3.bf16.msra.mxu0 %v1070_v2  ;;  %964 = vmatprep.mubr.msk.bf16.mxu0 %vm1123_vm0, %v1122_v4  ;;  %v1163_v6 = vand.u32 127, %v32_v3  ;;  %v30_v9 = vunpack.c.l.bf16 %v29_v8  ;;  %v1078_v10 = vld [vmem:[%s1385_s0 + $0x40] sm:$0xff]   ;;  %v1080_v16 = vld [vmem:[%s1385_s0 + $0x50] sm:$0xff]   ;;  %v1075_v17 = vld [vmem:[%s1385_s0 + $0x28] sm:$0xff]  }
   0x6   :  { %950 = vmatprep.subr.bf16.mxu0 %v1122_v4  ;;  %984 = vmatprep.mubr.msk.bf16.mxu1 %vm1123_vm0, %v1122_v4  ;;  %v1074_v15 = vld [vmem:[%s1385_s0 + $0x20] sm:$0xff]   ;;  %v1081_v18 = vld [vmem:[%s1385_s0 + $0x58] sm:$0xff]   ;;  %v1076_v19 = vld [vmem:[%s1385_s0 + $0x30] sm:$0xff]  }
   0x7   :  { %vm35_vm1 = vcmp.lt.s32.totalorder %v1163_v6, 32  ;;  %969 = vmatpush3.bf16.msra.mxu1 %v1078_v10  ;;  %v1082_v20 = vld [vmem:[%s1385_s0 + $0x60] sm:$0xff]   ;;  %v1077_v21 = vld [vmem:[%s1385_s0 + $0x38] sm:$0xff]   ;;  %v1083_v22 = vld [vmem:[%s1385_s0 + $0x68] sm:$0xff]   ;;  %vm746_vm3 = vcmp.eq.s32.totalorder %v1163_v6, 1 }
   0x8   :  { %v36_v12 = vsel %vm35_vm1, %v30_v9, %v10_v1  ;;  %970 = vmatprep.subr.bf16.mxu1 %v1122_v4  ;;  %v1084_v24 = vld [vmem:[%s1385_s0 + $0x70] sm:$0xff]   ;;  %v1085_v25 = vld [vmem:[%s1385_s0 + $0x78] sm:$0xff]   ;;  %v1086_v26 = vld [vmem:[%s1385_s0 + $0x80] sm:$0xff]  }
   0x9   :  { %951 = vmatpush3.bf16.msra.mxu0 %v1071_v5  ;;  %v37_v14 = vpack.c.bf16 %v1122_v4, %v36_v12  ;;  %v1087_v27 = vld [vmem:[%s1385_s0 + $0x88] sm:$0xff]   ;;  %v1088_v28 = vld [vmem:[%s1385_s0 + $0x90] sm:$0xff]   ;;  %v1089_v29 = vld [vmem:[%s1385_s0 + $0x98] sm:$0xff]  }
   0xa   :  { %952 = vmatprep.subr.bf16.mxu0 %v1122_v4  ;;  %v1090_v30 = vld [vmem:[%s1385_s0 + $0xa0] sm:$0xff]   ;;  %v1091_v31 = vld [vmem:[%s1385_s0 + $0xa8] sm:$0xff]   ;;  %v1092_v40 = vld [vmem:[%s1385_s0 + $0xb0] sm:$0xff]  }
   0xb   :  { %39 = vst [vmem:[#allocation7] sm:$0xf] %v37_v14  ;;  %971 = vmatpush3.bf16.msra.mxu1 %v1079_v13  ;;  %v755_v32 = vld [vmem:[%s1386_s1] ss:$0 sm:$0xff]  ;;  %v1093_v41 = vld [vmem:[%s1385_s0 + $0xb8] sm:$0xff]   ;;  %v1095_v43 = vld [vmem:[%s1385_s0 + $0xc8] sm:$0xff]  }
   0xc   :  { %972 = vmatprep.subr.bf16.mxu1 %v1122_v4  ;;  %v1094_v42 = vld [vmem:[%s1385_s0 + $0xc0] sm:$0xff]   ;;  %v1096_v44 = vld [vmem:[%s1385_s0 + $0xd0] sm:$0xff]   ;;  %v1097_v45 = vld [vmem:[%s1385_s0 + $0xd8] sm:$0xff]  }
   0xd   :  { %953 = vmatpush3.bf16.msra.mxu0 %v1072_v7  ;;  %v1098_v46 = vld [vmem:[%s1385_s0 + $0xe0] sm:$0xff]   ;;  %v1099_v47 = vld [vmem:[%s1385_s0 + $0xe8] sm:$0xff]   ;;  %v1100_v56 = vld [vmem:[%s1385_s0 + $0xf0] sm:$0xff]  }
   0xe   :  { %954 = vmatprep.subr.bf16.mxu0 %v1122_v4  ;;  %v781_v48 = vld [vmem:[%s1386_s1 + $0x1] ss:$0 sm:$0xff]  ;;  %v1101_v57 = vld [vmem:[%s1385_s0 + $0xf8] sm:$0xff]   ;;  %v1103_v59 = vld [vmem:[%s1385_s0 + $0x108] sm:$0xff]  }
   0xf   :  { %973 = vmatpush3.bf16.msra.mxu1 %v1080_v16  ;;  %v1102_v58 = vld [vmem:[%s1385_s0 + $0x100] sm:$0xff]   ;;  %v1104_v60 = vld [vmem:[%s1385_s0 + $0x110] sm:$0xff]   ;;  %v1105_v61 = vld [vmem:[%s1385_s0 + $0x118] sm:$0xff]  }
  0x10   :  { %974 = vmatprep.subr.bf16.mxu1 %v1122_v4  ;;  %v1106_v62 = vld [vmem:[%s1385_s0 + $0x120] sm:$0xff]   ;;  %v1107_v63 = vld [vmem:[%s1385_s0 + $0x128] sm:$0xff]   ;;  %v1108_v10 = vld [vmem:[%s1385_s0 + $0x130] sm:$0xff]  }
  0x11   :  { %955 = vmatpush3.bf16.msra.mxu0 %v1073_v11  ;;  %v807_v0 = vld [vmem:[%s1386_s1 + $0x2] ss:$0 sm:$0xff]  ;;  %v1109_v11 = vld [vmem:[%s1385_s0 + $0x138] sm:$0xff]   ;;  %v1111_v13 = vld [vmem:[%s1385_s0 + $0x148] sm:$0xff]  }
  0x12   :  { %956 = vmatprep.subr.bf16.mxu0 %v1122_v4  ;;  %v41_v23 = vld [vmem:[#allocation7] sm:$0xf]  ;;  %v1112_v14 = vld [vmem:[%s1385_s0 + $0x150] sm:$0xff]  }
  0x13   :  { %975 = vmatpush3.bf16.msra.mxu1 %v1081_v18  ;;  %v1110_v12 = vld [vmem:[%s1385_s0 + $0x140] sm:$0xff]  }
  0x14   :  { %976 = vmatprep.subr.bf16.mxu1 %v1122_v4  ;;  %v1114_v16 = vld [vmem:[%s1385_s0 + $0x160] sm:$0xff]  }
  0x15   :  { %957 = vmatpush3.bf16.msra.mxu0 %v1074_v15  ;;  %v1113_v15 = vld [vmem:[%s1385_s0 + $0x158] sm:$0xff]   ;;  %v833_v18 = vld [vmem:[%s1386_s1 + $0x3] ss:$0 sm:$0xff] }
  0x16   :  { %958 = vmatprep.subr.bf16.mxu0 %v1122_v4 }
  0x17   :  { %977 = vmatpush3.bf16.msra.mxu1 %v1082_v20 }
  0x18   :  { %978 = vmatprep.subr.bf16.mxu1 %v1122_v4 }
  0x19   :  { %959 = vmatpush3.bf16.msra.mxu0 %v1075_v17  ;;  %v1115_v17 = vld [vmem:[%s1385_s0 + $0x168] sm:$0xff]  }
  0x1a   :  { %960 = vmatprep.subr.bf16.mxu0 %v1122_v4 }
  0x1b   :  { %979 = vmatpush3.bf16.msra.mxu1 %v1083_v22 }
  0x1c   :  { %980 = vmatprep.subr.bf16.mxu1 %v1122_v4 }
  0x1d   :  { %961 = vmatpush3.bf16.msra.mxu0 %v1076_v19 }
  0x1e   :  { %962 = vmatprep.subr.bf16.mxu0 %v1122_v4 }
  0x1f   :  { %981 = vmatpush3.bf16.msra.mxu1 %v1084_v24 }
  0x20   :  { %982 = vmatprep.subr.bf16.mxu1 %v1122_v4 }
  0x21   :  { %963 = vmatpush3.bf16.msra.mxu0 %v1077_v21 }
  0x22   :  { %988 = vmatprep.subr.bf16.mxu0 %v1122_v4 }
  0x23   :  { %983 = vmatpush3.bf16.msra.mxu1 %v1085_v25 }
  0x24   :  { %965 = vmatmul.mubr.bf16.vlgmr.msra.gmra.mrb[0].mxu0 %v41_v23  ;;  %1008 = vmatprep.subr.bf16.mxu1 %v1122_v4 }
  0x25   :  { %1004 = vmatprep.mubr.msk.bf16.mxu0 %vm1123_vm0, %v1122_v4  ;;  %989 = vmatpush3.bf16.msra.mxu0 %v1086_v26  ;;  %v1116_v26 = vld [vmem:[%s1385_s0 + $0x170] sm:$0xff]  }
  0x26   :  { %990 = vmatprep.subr.bf16.mxu0 %v1122_v4 }
  0x29   :  { %991 = vmatpush3.bf16.msra.mxu0 %v1087_v27  ;;  %v1117_v27 = vld [vmem:[%s1385_s0 + $0x178] sm:$0xff]  }
  0x2a   :  { %992 = vmatprep.subr.bf16.mxu0 %v1122_v4 }
  0x2d   :  { %993 = vmatpush3.bf16.msra.mxu0 %v1088_v28  ;;  %v859_v28 = vld [vmem:[%s1386_s1 + $0x4] ss:$0 sm:$0xff] }
  0x2e   :  { %994 = vmatprep.subr.bf16.mxu0 %v1122_v4 }
  0x31   :  { %995 = vmatpush3.bf16.msra.mxu0 %v1089_v29 }
  0x32   :  { %996 = vmatprep.subr.bf16.mxu0 %v1122_v4 }
  0x35   :  { %997 = vmatpush3.bf16.msra.mxu0 %v1090_v30 }
  0x36   :  { %998 = vmatprep.subr.bf16.mxu0 %v1122_v4 }
  0x39   :  { %999 = vmatpush3.bf16.msra.mxu0 %v1091_v31 }
  0x3a   :  { %1000 = vmatprep.subr.bf16.mxu0 %v1122_v4 }
  0x3d   :  { %1001 = vmatpush3.bf16.msra.mxu0 %v1092_v40 }
  0x3e   :  { %1002 = vmatprep.subr.bf16.mxu0 %v1122_v4 }
  0x41   :  { %1003 = vmatpush3.bf16.msra.mxu0 %v1093_v41 }
  0x42   :  { %1028 = vmatprep.subr.bf16.mxu0 %v1122_v4 }
  0xf7   :  { %v147_v33 = vpop.f32.mrb[0].mxu0 }
  0xf8   :  { %v148_v34 = vadd.f32 %v755_v32, %v147_v33  ;;  %v966_v35 = vpop.f32.mrb[1].mxu0 }
  0xf9   :  { %v150_v36 = vpop.f32.mrb[2].mxu0 }
  0xfa   :  { %v153_v37 = vmax.f32 %v148_v34, 0.0  ;;  %v967_v38 = vpop.f32.mrb[3].mxu0 }
  0xfc   :  { %v154_v39 = vpack.c.bf16 %v153_v37, %v153_v37 }
  0xfe   :  { %985 = vmatmul.mubr.bf16.vlgmr.msra.gmra.mrb[0].mxu1 %v154_v39 }
  0xff   :  { %1024 = vmatprep.mubr.msk.bf16.mxu1 %vm1123_vm0, %v1122_v4  ;;  %1009 = vmatpush3.bf16.msra.mxu1 %v1094_v42 }
 0x100   :  { %1010 = vmatprep.subr.bf16.mxu1 %v1122_v4 }
 0x103   :  { %1011 = vmatpush3.bf16.msra.mxu1 %v1095_v43 }
 0x104   :  { %1012 = vmatprep.subr.bf16.mxu1 %v1122_v4 }
 0x107   :  { %1013 = vmatpush3.bf16.msra.mxu1 %v1096_v44 }
 0x108   :  { %1014 = vmatprep.subr.bf16.mxu1 %v1122_v4 }
 0x10b   :  { %1015 = vmatpush3.bf16.msra.mxu1 %v1097_v45 }
 0x10c   :  { %1016 = vmatprep.subr.bf16.mxu1 %v1122_v4 }
 0x10f   :  { %1017 = vmatpush3.bf16.msra.mxu1 %v1098_v46 }
 0x110   :  { %1018 = vmatprep.subr.bf16.mxu1 %v1122_v4 }
 0x113   :  { %1019 = vmatpush3.bf16.msra.mxu1 %v1099_v47 }
 0x114   :  { %1020 = vmatprep.subr.bf16.mxu1 %v1122_v4 }
 0x117   :  { %1021 = vmatpush3.bf16.msra.mxu1 %v1100_v56 }
 0x118   :  { %1022 = vmatprep.subr.bf16.mxu1 %v1122_v4 }
 0x11b   :  { %1023 = vmatpush3.bf16.msra.mxu1 %v1101_v57 }
 0x11c   :  { %1048 = vmatprep.subr.bf16.mxu1 %v1122_v4 }
 0x1d1   :  { %v262_v49 = vpop.f32.mrb[0].mxu1 }
 0x1d2   :  { %v263_v50 = vadd.f32 %v781_v48, %v262_v49  ;;  %v986_v51 = vpop.f32.mrb[1].mxu1 }
 0x1d3   :  { %v265_v52 = vpop.f32.mrb[2].mxu1 }
 0x1d4   :  { %v268_v53 = vmax.f32 %v263_v50, 0.0  ;;  %v987_v54 = vpop.f32.mrb[3].mxu1 }
 0x1d6   :  { %v269_v55 = vpack.c.bf16 %v268_v53, %v268_v53 }
 0x1d8   :  { %1005 = vmatmul.mubr.bf16.vlgmr.msra.gmra.mrb[4].mxu0 %v269_v55 }
 0x1d9   :  { %1044 = vmatprep.mubr.msk.bf16.mxu0 %vm1123_vm0, %v1122_v4  ;;  %1029 = vmatpush3.bf16.msra.mxu0 %v1102_v58 }
 0x1da   :  { %1030 = vmatprep.subr.bf16.mxu0 %v1122_v4 }
 0x1dd   :  { %1031 = vmatpush3.bf16.msra.mxu0 %v1103_v59 }
 0x1de   :  { %1032 = vmatprep.subr.bf16.mxu0 %v1122_v4 }
 0x1e1   :  { %1033 = vmatpush3.bf16.msra.mxu0 %v1104_v60 }
 0x1e2   :  { %1034 = vmatprep.subr.bf16.mxu0 %v1122_v4 }
 0x1e5   :  { %1035 = vmatpush3.bf16.msra.mxu0 %v1105_v61 }
 0x1e6   :  { %1036 = vmatprep.subr.bf16.mxu0 %v1122_v4 }
 0x1e9   :  { %1037 = vmatpush3.bf16.msra.mxu0 %v1106_v62 }
 0x1ea   :  { %1038 = vmatprep.subr.bf16.mxu0 %v1122_v4 }
 0x1ed   :  { %1039 = vmatpush3.bf16.msra.mxu0 %v1107_v63 }
 0x1ee   :  { %1040 = vmatprep.subr.bf16.mxu0 %v1122_v4 }
 0x1f1   :  { %1041 = vmatpush3.bf16.msra.mxu0 %v1108_v10 }
 0x1f2   :  { %1042 = vmatprep.subr.bf16.mxu0 %v1122_v4 }
 0x1f5   :  { %1043 = vmatpush3.bf16.msra.mxu0 %v1109_v11 }
 0x2ab   :  { %v377_v1 = vpop.f32.mrb[4].mxu0 }
 0x2ac   :  { %v378_v2 = vadd.f32 %v807_v0, %v377_v1  ;;  %v1006_v3 = vpop.f32.mrb[5].mxu0 }
 0x2ad   :  { %v380_v5 = vpop.f32.mrb[6].mxu0 }
 0x2ae   :  { %v383_v7 = vmax.f32 %v378_v2, 0.0  ;;  %v1007_v8 = vpop.f32.mrb[7].mxu0 }
 0x2b0   :  { %v384_v9 = vpack.c.bf16 %v383_v7, %v383_v7 }
 0x2b2   :  { %1025 = vmatmul.mubr.bf16.vlgmr.msra.gmra.mrb[4].mxu1 %v384_v9 }
 0x2b3   :  { %1064 = vmatprep.mubr.msk.bf16.mxu1 %vm1123_vm0, %v1122_v4  ;;  %1049 = vmatpush3.bf16.msra.mxu1 %v1110_v12 }
 0x2b4   :  { %1050 = vmatprep.subr.bf16.mxu1 %v1122_v4 }
 0x2b7   :  { %1051 = vmatpush3.bf16.msra.mxu1 %v1111_v13 }
 0x2b8   :  { %1052 = vmatprep.subr.bf16.mxu1 %v1122_v4 }
 0x2bb   :  { %1053 = vmatpush3.bf16.msra.mxu1 %v1112_v14 }
 0x2bc   :  { %1054 = vmatprep.subr.bf16.mxu1 %v1122_v4 }
 0x2bf   :  { %1055 = vmatpush3.bf16.msra.mxu1 %v1113_v15 }
 0x2c0   :  { %1056 = vmatprep.subr.bf16.mxu1 %v1122_v4 }
 0x2c3   :  { %1057 = vmatpush3.bf16.msra.mxu1 %v1114_v16 }
 0x2c4   :  { %1058 = vmatprep.subr.bf16.mxu1 %v1122_v4 }
 0x2c7   :  { %1059 = vmatpush3.bf16.msra.mxu1 %v1115_v17 }
 0x2c8   :  { %1060 = vmatprep.subr.bf16.mxu1 %v1122_v4 }
 0x2cb   :  { %1061 = vmatpush3.bf16.msra.mxu1 %v1116_v26 }
 0x2cc   :  { %1062 = vmatprep.subr.bf16.mxu1 %v1122_v4  ;;  %v885_v4 = vld [vmem:[%s1386_s1 + $0x5] ss:$0 sm:$0xff] }
 0x2cf   :  { %1063 = vmatpush3.bf16.msra.mxu1 %v1117_v27 }
 0x385   :  { %v492_v19 = vpop.f32.mrb[4].mxu1 }
 0x386   :  { %v493_v20 = vadd.f32 %v833_v18, %v492_v19  ;;  %v1026_v21 = vpop.f32.mrb[5].mxu1 }
 0x387   :  { %v495_v22 = vpop.f32.mrb[6].mxu1 }
 0x388   :  { %v498_v23 = vmax.f32 %v493_v20, 0.0  ;;  %v1027_v24 = vpop.f32.mrb[7].mxu1 }
 0x38a   :  { %v499_v25 = vpack.c.bf16 %v498_v23, %v498_v23 }
 0x38c   :  { %1045 = vmatmul.mubr.bf16.vlgmr.msra.gmra.mrb[8].mxu0 %v499_v25 }
 0x45f   :  { %v607_v29 = vpop.f32.mrb[8].mxu0 }
 0x460   :  { %v608_v30 = vadd.f32 %v859_v28, %v607_v29  ;;  %v1046_v31 = vpop.f32.mrb[9].mxu0 }
 0x461   :  { %v610_v32 = vpop.f32.mrb[10].mxu0 }
 0x462   :  { %v613_v33 = vmax.f32 %v608_v30, 0.0  ;;  %v1047_v34 = vpop.f32.mrb[11].mxu0 }
 0x464   :  { %v614_v35 = vpack.c.bf16 %v613_v33, %v613_v33 }
 0x466   :  { %1065 = vmatmul.mubr.bf16.vlgmr.msra.gmra.mrb[8].mxu1 %v614_v35 }
 0x539   :  { %v722_v36 = vpop.f32.mrb[8].mxu1 }
 0x53a   :  { %v723_v37 = vadd.f32 %v885_v4, %v722_v36  ;;  %v1066_v38 = vpop.f32.mrb[9].mxu1 }
 0x53b   :  { %v725_v39 = vpop.f32.mrb[10].mxu1 }
 0x53c   :  { %v729_v40 = vand.u32 2147483647, %v723_v37  ;;  %v1067_v41 = vpop.f32.mrb[11].mxu1  ;;  %v728_v52 = vmax.f32 %v723_v37, 0.0  ;;  %v747_v56 = vsel %vm746_vm3, %v723_v37, 0.0 }
 0x53e   :  { %v730_v42 = vsub.f32 0.0, %v729_v40 }
 0x540   :  { %v731_v43 = vmul.f32 1.442695, %v730_v42 }
 0x542   :  { %1118 = vpow2.f32 %v731_v43 }
 0x54c   :  { %v1119_v44 = vpop.eup %1118 }
 0x54d   :  { %v733_v45 = vadd.f32 1.0, %v1119_v44  ;;  %v736_v46 = vmul.f32 -0.5, %v1119_v44  ;;  %v739_v48 = vand.u32 2147483647, %v1119_v44 }
 0x54f   :  { %1120 = vlog2.f32 %v733_v45  ;;  %v737_v47 = vadd.f32 1.0, %v736_v46  ;;  %vm740_vm2 = vcmp.lt.f32.partialorder %v739_v48, 0.0004427343 }
 0x551   :  { %v738_v51 = vmul.f32 %v1119_v44, %v737_v47 }
 0x559   :  { %v1121_v49 = vpop.eup %1120 }
 0x55a   :  { %v735_v50 = vmul.f32 0.6931472, %v1121_v49 }
 0x55c   :  { %v741_v53 = vsel %vm740_vm2, %v738_v51, %v735_v50 }
 0x55d   :  { %v742_v54 = vadd.f32 %v741_v53, %v728_v52 }
 0x55f   :  { %v743_v55 = vsub.f32 0.0, %v742_v54 }
 0x561   :  { %v748_v57 = vadd.f32 %v747_v56, %v743_v55 }
 0x563   :  { %v749_v58 = vpack.c.bf16 %v748_v57, %v748_v57 }
 0x565   :  { %750 = vst [vmem:[%s1389_s4] sm:$0xf] %v749_v58 }

</bundles_post_ra>
